<compile_context>
chip_gen: v7x
topology: tpu7x:2x2x1
jax: 0.10.0
libtpu: 0.0.40
codegen_flags: <defaults>
</compile_context>

<pallas_src>
import functools

import jax
import jax.numpy as jnp
from jax.experimental import pallas as pl
from jax.experimental.pallas import tpu as pltpu

_IMAGENET_MEAN = (0.485, 0.456, 0.406)
_IMAGENET_STD = (0.229, 0.224, 0.225)


def _normalize_kernel(mean_ref, inv_std_ref, x_ref, o_ref, *, num_channels,
                      compute_dtype):
    """o = (x - mean[c]) * inv_std[c] for this block's channel."""
    c = pl.program_id(0) % num_channels          # merged (N*C) axis -> channel
    m = mean_ref[c].astype(compute_dtype)        # scalar loads from SMEM
    inv_s = inv_std_ref[c].astype(compute_dtype)
    x = x_ref[...].astype(compute_dtype)
    o_ref[...] = ((x - m) * inv_s).astype(o_ref.dtype)


def _lane_dense_width(hw, max_lanes=2048):
    """Largest multiple-of-128 divisor of hw in [128, max_lanes], or 0."""
    for cand in range(max_lanes, 127, -128):
        if hw % cand == 0:
            return cand
    return 0


def _row_tile(rows, lanes, itemsize, max_block_bytes):
    """Sublane-aligned row tile so one (tr, lanes) block <= max_block_bytes."""
    if rows * lanes * itemsize <= max_block_bytes:
        return rows                               # whole plane in one block
    sub = 8 * max(1, 4 // itemsize)               # 8 (f32) / 16 (bf16) / 32 (i8)
    tr = (max_block_bytes // (lanes * itemsize)) // sub * sub
    return max(min(tr, rows), min(sub, rows))


def imagenet_normalize(x, *, max_block_bytes=4 * 1024 * 1024):
    """Pallas implementation of ImageNetNormalize.forward for NCHW input."""
    n, c, h, w = x.shape
    assert c == 3, "ImageNetNormalize expects 3-channel (RGB) NCHW input"
    assert jnp.issubdtype(x.dtype, jnp.floating), (
        "ImageNetNormalize expects a floating-point input (got %s)" % x.dtype)

    mean = jnp.asarray(_IMAGENET_MEAN, dtype=jnp.float32)
    inv_std = 1.0 / jnp.asarray(_IMAGENET_STD, dtype=jnp.float32)

    itemsize = x.dtype.itemsize
    hw = h * w

    # Lane-dense view when possible (free contiguous reshape / bitcast).
    lanes = _lane_dense_width(hw)
    if lanes:
        rows = hw // lanes
    else:
        rows, lanes = h, w                        # fallback: full-W last dim
    view_shape = (n * c, rows, lanes)
    xv = x.reshape(view_shape)

    tr = _row_tile(rows, lanes, itemsize, max_block_bytes)
    grid = (n * c, pl.cdiv(rows, tr))             # cdiv grid; Pallas masks tail
    blk = (1, tr, lanes)
    idx = lambda p, r, *prefetch: (p, r, 0)       # prefetch refs trail grid idx

    if x.dtype == jnp.float32 or x.dtype == jnp.bfloat16:
        compute_dtype = x.dtype                   # native compute (v6e/v7x bf16)
    else:
        compute_dtype = jnp.float32

    kernel = functools.partial(_normalize_kernel, num_channels=c,
                               compute_dtype=compute_dtype)

    out = pl.pallas_call(
        kernel,
        out_shape=jax.ShapeDtypeStruct(view_shape, x.dtype),
        grid_spec=pltpu.PrefetchScalarGridSpec(
            num_scalar_prefetch=2,                # mean, inv_std -> SMEM
            grid=grid,
            in_specs=[pl.BlockSpec(blk, idx)],
            out_specs=pl.BlockSpec(blk, idx),
        ),
        compiler_params=pltpu.CompilerParams(
            dimension_semantics=("parallel", "parallel"),
            vmem_limit_bytes=32 * 1024 * 1024,    # ~4x 4 MiB blocks fit all gens
        ),
    )(mean, inv_std, xv)

    return out.reshape(n, c, h, w)


def _reference(x):
    mean = jnp.asarray(_IMAGENET_MEAN, jnp.float32).reshape(1, 3, 1, 1)
    std = jnp.asarray(_IMAGENET_STD, jnp.float32).reshape(1, 3, 1, 1)
    return ((x.astype(jnp.float32) - mean) / std).astype(x.dtype)


if __name__ == "__main__":
    key = jax.random.PRNGKey(0)

    # Lane-dense path: H*W = 256 is a multiple of 128 -> (N*C, 1, 256) view.
    x = jax.random.uniform(key, (2, 3, 16, 16), dtype=jnp.float32)
    out = jax.block_until_ready(imagenet_normalize(x))
    ref = _reference(x)
    assert out.shape == x.shape and out.dtype == x.dtype
    assert jnp.allclose(out, ref, rtol=1e-5, atol=1e-6), (
        float(jnp.max(jnp.abs(out - ref))))

    # Fallback path: H*W = 240 has no multiple-of-128 divisor -> full-W blocks.
    x2 = jax.random.uniform(jax.random.PRNGKey(1), (2, 3, 12, 20),
                            dtype=jnp.float32)
    out2 = jax.block_until_ready(imagenet_normalize(x2))
    ref2 = _reference(x2)
    assert jnp.allclose(out2, ref2, rtol=1e-5, atol=1e-6), (
        float(jnp.max(jnp.abs(out2 - ref2))))

    print("KERNEL_OK")
</pallas_src>

<mosaic_0001>
module attributes {stable_mosaic.version = 11 : i64} {
  func.func @_normalize_kernel(%arg0: i32, %arg1: i32, %arg2: memref<3xf32, #tpu.memory_space<smem>>, %arg3: memref<3xf32, #tpu.memory_space<smem>>, %arg4: memref<1x1x256xf32, #tpu.memory_space<vmem>>, %arg5: memref<1x1x256xf32, #tpu.memory_space<vmem>>) attributes {dimension_semantics = [#tpu.dimension_semantics<parallel>, #tpu.dimension_semantics<parallel>], iteration_bounds = array<i64: 6, 1>, scalar_prefetch = 2 : i64, scratch_operands = 0 : i64, tpu.core_type = #tpu.core_type<tc>, window_params = [{transform_indices = @transform_0, window_bounds = array<i64: 1, 1, 256>}, {transform_indices = @transform_1, window_bounds = array<i64: 1, 1, 256>}]} {
    %c3_i32 = arith.constant 3 : i32
    %c0_i32 = arith.constant 0 : i32
    %0 = arith.cmpi eq, %c3_i32, %c0_i32 : i32
    %c1_i32 = arith.constant 1 : i32
    %1 = arith.select %0, %c1_i32, %c3_i32 : i32
    %2 = arith.remsi %arg0, %1 : i32
    %c0_i32_0 = arith.constant 0 : i32
    %3 = arith.cmpi ne, %2, %c0_i32_0 : i32
    %c0_i32_1 = arith.constant 0 : i32
    %4 = arith.cmpi slt, %2, %c0_i32_1 : i32
    %c0_i32_2 = arith.constant 0 : i32
    %5 = arith.cmpi slt, %1, %c0_i32_2 : i32
    %6 = arith.xori %4, %5 : i1
    %7 = arith.andi %6, %3 : i1
    %8 = arith.addi %2, %1 : i32
    %9 = arith.select %7, %8, %2 : i32
    %10 = arith.index_cast %9 : i32 to index
    %11 = memref.load %arg2[%10] : memref<3xf32, #tpu.memory_space<smem>>
    %12 = arith.index_cast %9 : i32 to index
    %13 = memref.load %arg3[%12] : memref<3xf32, #tpu.memory_space<smem>>
    %c0 = arith.constant 0 : index
    %c0_3 = arith.constant 0 : index
    %c0_4 = arith.constant 0 : index
    %14 = vector.load %arg4[%c0, %c0_3, %c0_4] : memref<1x1x256xf32, #tpu.memory_space<vmem>>, vector<1x1x256xf32>
    %15 = vector.broadcast %11 : f32 to vector<1x1x256xf32>
    %16 = arith.subf %14, %15 : vector<1x1x256xf32>
    %17 = vector.broadcast %13 : f32 to vector<1x1x256xf32>
    %18 = arith.mulf %16, %17 : vector<1x1x256xf32>
    %c0_5 = arith.constant 0 : index
    %c0_6 = arith.constant 0 : index
    %c0_7 = arith.constant 0 : index
    %19 = vector.load %arg5[%c0_5, %c0_6, %c0_7] : memref<1x1x256xf32, #tpu.memory_space<vmem>>, vector<1x1x256xf32>
    tpu.vector_store %arg5[%c0_5, %c0_6, %c0_7], %18 {strides = array<i32>} : memref<1x1x256xf32, #tpu.memory_space<vmem>>, vector<1x1x256xf32>,
    return
  }
  func.func @transform_0(%arg0: i32, %arg1: i32, %arg2: memref<3xf32, #tpu.memory_space<smem>>, %arg3: memref<3xf32, #tpu.memory_space<smem>>) -> (i32, i32, i32) {
    %c0_i32 = arith.constant 0 : i32
    %c0_i32_0 = arith.constant 0 : i32
    return %arg0, %arg1, %c0_i32 : i32, i32, i32
  }
  func.func @transform_1(%arg0: i32, %arg1: i32, %arg2: memref<3xf32, #tpu.memory_space<smem>>, %arg3: memref<3xf32, #tpu.memory_space<smem>>) -> (i32, i32, i32) {
    %c0_i32 = arith.constant 0 : i32
    %c0_i32_0 = arith.constant 0 : i32
    return %arg0, %arg1, %c0_i32 : i32, i32, i32
  }
}

</mosaic_0001>

<bundles_post_ra>
// kernel: tpu_custom_call.1
= control target key start
LH: loop header
LB: loop body
LE: loop exit
PB: predicated region body
PF: predicated region fallthrough
CT: control target
= control target key end

     0   :  { %s724_s0 = inlined_call_operand.hbm [shape: f32[3], index: 0, kind: input, shape index: {}]   ;;  %s725_s2 = inlined_call_operand.hbm [shape: f32[6,1,256], index: 2, kind: input, shape index: {}]   ;;  %s726_s3 = inlined_call_operand.hbm [shape: f32[6,1,256], index: 3, kind: output, shape index: {}]   ;;  %s727_s1 = inlined_call_operand.vmem [shape: f32[3], index: 1, kind: input, shape index: {}]  }
   0x1   :  { %s374_s14 = scalar_lea.hbm %s724_s0, 16 }
   0x2   :  { %p375_p0 = scmp.ne.s32.totalorder %s724_s0, %s374_s14  ;;  %p378_p1 = scmp.lt.u32.totalorder %s374_s14, %s724_s0 }
   0x4   :  { %p380_p2 = pnand %p378_p1, %p375_p0 }
   0x6   :  { %383 = shalt.err (!%p380_p2)  }
   0x7   :  { %s512_s19 = smov [#allocation3]   ;;  %s10_s24 = sshll.u32 %s727_s1, 4  ;;  %s11_s24 = int_to_ptr.vmem [resolvable:$true] %s10_s24 }
   0x8   :  { %9 = dma.hbm_to_smem %s724_s0, 16, %s512_s19, [#allocation2] }
   0x9   :  { %s384_s25 = scalar_lea.vmem %s11_s24, 16  ;;  %p389_p4 = scmp.lt.s32.totalorder %s11_s24, %s11_s24 }
   0xa   :  { %p385_p3 = scmp.ne.s32.totalorder %s11_s24, %s384_s25  ;;  %p390_p5 = scmp.lt.s32.totalorder %s384_s25, %s384_s25 }
   0xc   :  { %p391_p6 = por %p390_p5, %p389_p4 }
   0xe   :  { %p392_p7 = pnand %p391_p6, %p385_p3 }
  0x10   :  { %395 = shalt.err (!%p392_p7)  }
  0x11   :  { %s513_s26 = smov [#allocation4]  }
  0x12   :  { %13 = dma.vmem_to_smem %s11_s24, 16, %s513_s26, [#allocation2] }
  0x13   :  { %478 = dma.done.wait [#allocation2], 32 }
  0x14   :  { %479 = vsyncadd [#allocation2], 4294967264 }
  0x15   :  { %15 = sfence }
  0x16   :  { %16 = vsyncpa [#allocation6], 0 }
  0x17   :  { %18 = vsyncpa [#allocation6 + $0x1], 0 }
  0x18   :  { %19 = vsyncpa [#allocation7], 0 }
  0x19   :  { %21 = vsyncpa [#allocation7 + $0x1], 0  ;;  %s551_s0 = smov 0   ;;  %s553_s1 = smov 0  }
  0x1a   :  { %s555_s27 = smov 0   ;;  %s557_s28 = smov 0  }
  0x1b   :  { %s559_s29 = smov 0   ;;  %s561_s30 = smov 0  }
  0x1c LB: > { %s287_s4 = sadd.s32 4294967295, %s510_s30   ;;  %s288_s5 = sadd.s32 4294967294, %s510_s30   ;;  %s510_s30 = sphi %s561_s30, %s27_s30   ;;  %s506_s29 = sphi %s559_s29, %s742_s29   ;;  %s502_s28 = sphi %s557_s28, %s741_s28   ;;  %s498_s27 = sphi %s555_s27, %s740_s27   ;;  %s494_s1 = sphi %s553_s1, %s739_s1   ;;  %s490_s0 = sphi %s551_s0, %s738_s0  }
  0x1d   : > { %s39_s6 = sadd.s32 1, %s506_s29  ;;  %s48_s7 = sadd.s32 1, %s498_s27 }
  0x1e   : > { %p41_p8 = scmp.ge.s32.totalorder %s39_s6, 6  ;;  %p55_p9 = scmp.ne.s32.totalorder %s498_s27, %s494_s1 }
  0x1f   : > { %p56_p10 = scmp.eq.s32.totalorder %s510_s30, 0  ;;  %p61_p11 = scmp.ne.s32.totalorder %s494_s1, %s490_s0 }
  0x20   : > { %s744_s6 = smov (%p41_p8, %s39_s6), 0  ;;  %p62_p13 = scmp.eq.s32.totalorder %s287_s4, 0 }
  0x21   : > { %p592_p12 = por %p56_p10, %p55_p9  ;;  %s43_s9 = ssub.s32 %s506_s29, %s744_s6 }
  0x22   : > { %p87_p0 = scmp.eq.s32.totalorder %s287_s4, 5  ;;  %p46_p1 = scmp.eq.s32.totalorder %s43_s9, 0 }
  0x23   : > { %p598_p2 = por %p62_p13, %p61_p11  ;;  %p93_p4 = scmp.eq.s32.totalorder %s288_s5, 5 }
  0x24   : > { %p602_p3 = por %p87_p0, %p55_p9  ;;  %p319_p6 = scmp.lt.s32.totalorder %s510_s30, 6 }
  0x25   : > { %s607_s12 = scalar_select %p46_p1, %s498_s27, %s48_s7  }
  0x26   : > { %s731_s11 = scalar_select %p602_p3, 1, 0 }
  0x27   : > { %p609_p5 = por %p93_p4, %p61_p11  ;;  %s113_s14 = sand.u32 1, %s498_s27  }
  0x28   : > { %s291_s15 = sshll.u32 %s113_s14, 1  ;;  %s305_s16 = sshll.u32 %s506_s29, 5 }
  0x29   : > { %s732_s13 = scalar_select %p609_p5, 1, 0 }
  0x2a   : > { %s619_s19 = scalar_lea.hbm %s725_s2, %s305_s16  ;;  %s117_s20 = scalar_lea.vmem [#allocation5], %s291_s15 }
  0x2b   : > { %s127_s21 = sshll.u32 %s117_s20, 4  ;;  %p625_p7 = pnand %p319_p6, %p592_p12  ;;  %s621_s21 = int_to_ptr.vmem [resolvable:$true] %s127_s21 }
  0x2c   : > { %s114_s23 = scalar_lea.sflag [#allocation6], %s113_s14  ;;  %s396_s24 = scalar_lea.hbm %s619_s19, 32 }
  0x2d   : > { %p397_p10 = scmp.ne.s32.totalorder %s619_s19, %s396_s24  ;;  %p398_p11 = pneg %p625_p7 }
  0x2e   : > { %s401_s4 = scalar_lea.hbm %s725_s2, 192  ;;  %p402_p12 = scmp.lt.u32.totalorder %s619_s19, %s725_s2 }
  0x2f   : > { %p399_p13 = pnand %p398_p11, %p397_p10  ;;  %p403_p1 = scmp.lt.u32.totalorder %s401_s4, %s396_s24 }
  0x30   : > { %p405_p6 = scmp.lt.u32.totalorder %s396_s24, %s619_s19 }
  0x31   : > { %p400_p0 = pneg %p399_p13  ;;  %p404_p4 = por %p403_p1, %p402_p12 }
  0x33   : > { %p406_p8 = por %p405_p6, %p404_p4 }
  0x35   : > { %p407_p9 = pnand %p406_p8, %p400_p0 }
  0x37   : > { %410 = shalt.err (!%p407_p9)
}
  0x38   : > { %s411_s8 = scalar_lea.vmem %s621_s21, 32  ;;  %s514_s9 = smov [#allocation5]  }
  0x39   : > { %p412_p10 = scmp.ne.s32.totalorder %s621_s21, %s411_s8  ;;  %s416_s14 = sshll.u32 %s514_s9, 4  ;;  %s417_s14 = int_to_ptr.vmem [resolvable:$false] %s416_s14 }
  0x3a   : > { %s418_s15 = scalar_lea.vmem %s417_s14, 64  ;;  %p419_p3 = scmp.lt.s32.totalorder %s621_s21, %s417_s14 }
  0x3b   : > { %p414_p13 = pnand %p412_p10, %p398_p11  ;;  %p420_p12 = scmp.lt.s32.totalorder %s418_s15, %s411_s8 }
  0x3d   : > { %p415_p5 = pneg %p414_p13  ;;  %p421_p1 = por %p420_p12, %p419_p3 }
  0x3f   : > { %p422_p4 = pnand %p421_p1, %p415_p5 }
  0x41   : > { %425 = shalt.err (!%p422_p4)
}
  0x42   : > { %314 = dma.hbm_to_vmem [thread:$0]  (!%p625_p7), %s619_s19, 32, %s621_s21, %s114_s23  }
  0x43   : > { %p734_p8 = scmp.lt.s32.totalorder %s510_s30, 7  ;;  %p735_p9 = scmp.ge.s32.totalorder %s510_s30, 1 }
  0x45   : > { %p133_p11 = pnand %p735_p9, %p734_p8 }
  0x46   : > { %s661_s16 = sand.u32 (!%p133_p11), 1, %s494_s1  }
  0x47   : > { %136 = sbr.rel (%p133_p11) target bundleno = 121 (0x79), region = 24  ;;  %s295_s17 = sshll.u32 (!%p133_p11), %s661_s16, 1 }
  0x48   : > { %s139_s18 = scalar_lea.sflag (!%p133_p11), [#allocation6], %s661_s16  ;;  %s142_s20 = scalar_lea.vmem (!%p133_p11), [#allocation5], %s295_s17 }
  0x4e   : > { %481 = dma.done.wait (%p598_p2), %s139_s18, 32  }
  0x4f   : > { %483 = vsyncadd (%p598_p2), %s139_s18, 4294967264  ;;  %s162_s19 = ssub.s32 0, %s502_s28  ;;  %p161_p3 = scmp.lt.s32.totalorder %s502_s28, 0  ;;  %v176_v0 = vld [vmem:[%s142_s20] sm:$0x3]  ;;  %v181_v1 = vlaneseq }
  0x50   : > { %s297_s21 = smin.u32 %s502_s28, %s162_s19  ;;  %s160_s10 = scalar_lea.vmem [#allocation8], %s295_s17 }
  0x51   : > { %372 = sdivrem.u32 %s297_s21, 3  ;;  %s203_s4 = sshll.u32 %s160_s10, 4  ;;  %vm183_vm0 = vcmp.lt.s32.totalorder %v181_v1, 256  ;;  %s673_s4 = int_to_ptr.vmem [resolvable:$true] %s203_s4 }
  0x52   : > { %s306_s5 = sshll.u32 %s502_s28, 5  ;;  %s187_s14 = scalar_lea.sflag [#allocation7], %s661_s16 }
  0x53   : > { %s678_s9 = scalar_lea.hbm %s726_s3, %s306_s5  ;;  %s426_s15 = scalar_lea.vmem %s673_s4, 32 }
  0x54   : > { %p427_p2 = scmp.ne.s32.totalorder %s673_s4, %s426_s15  ;;  %p736_p7 = scmp.ne.s32.totalorder %s731_s11, 0 }
  0x55   : > { %s515_s28 = smov [#allocation8]  }
  0x56   : > { %p428_p0 = pnand %p427_p2, %p736_p7  ;;  %s430_s17 = sshll.u32 %s515_s28, 4  ;;  %s431_s17 = int_to_ptr.vmem [resolvable:$false] %s430_s17 }
  0x57   : > { %s432_s18 = scalar_lea.vmem %s431_s17, 64  ;;  %p433_p10 = scmp.lt.s32.totalorder %s673_s4, %s431_s17 }
  0x58   : > { %p429_p6 = pneg %p428_p0  ;;  %p434_p13 = scmp.lt.s32.totalorder %s432_s18, %s426_s15 }
  0x5a   : > { %s373_s22 = spop.drf %372  ;;  %p435_p12 = por %p434_p13, %p433_p10 }
  0x5b   : > { %s166_s23 = ssub.s32 0, %s373_s22 }
  0x5c   : > { %s746_s23 = smov (!%p161_p3, %s166_s23), %s373_s22  ;;  %p436_p1 = pnand %p435_p12, %p429_p6 }
  0x5d   : > { %p299_p5 = scmp.lt.s32.totalorder %s746_s23, 0  ;;  %s172_s24 = sadd.s32 3, %s746_s23 }
  0x5f   : > { %s748_s24 = smov (!%p299_p5, %s172_s24), %s746_s23 }
  0x60   : > { %s174_s25 = sld [smem:[#allocation3 + %s748_s24]] }
  0x61   : > { %s175_s26 = sld [smem:[#allocation4 + %s748_s24]] }
  0x66   : > { %v177_v2 = vstv %s174_s25 }
  0x67   : > { %v178_v3 = vsub.f32 %v176_v0, %v177_v2  ;;  %v179_v4 = vstv %s175_s26 }
  0x69   : > { %v180_v5 = vmul.f32 %v179_v4, %v178_v3 }
  0x6b   : > { %185 = vst.msk [vmem:[%s160_s10] sm:$0x3] %vm183_vm0, %v180_v5 }
  0x6c   : > { %439 = shalt.err (!%p436_p1)
}
  0x6d   : > { %s440_s16 = scalar_lea.hbm %s678_s9, 32  ;;  %s444_s21 = scalar_lea.hbm %s726_s3, 192 }
  0x6e   : > { %p441_p4 = scmp.ne.s32.totalorder %s678_s9, %s440_s16  ;;  %p445_p11 = scmp.lt.u32.totalorder %s678_s9, %s726_s3 }
  0x6f   : > { %p446_p3 = scmp.lt.u32.totalorder %s444_s21, %s440_s16  ;;  %p448_p2 = scmp.lt.u32.totalorder %s440_s16, %s678_s9 }
  0x70   : > { %p442_p8 = pnand %p441_p4, %p736_p7 }
  0x71   : > { %p447_p5 = por %p446_p3, %p445_p11 }
  0x72   : > { %p443_p9 = pneg %p442_p8 }
  0x73   : > { %p449_p0 = por %p448_p2, %p447_p5 }
  0x75   : > { %p450_p6 = pnand %p449_p0, %p443_p9 }
  0x77   : > { %453 = shalt.err (!%p450_p6)
}
  0x78   : > { %309 = dma.vmem_to_hbm [thread:$0]  (%p736_p7), %s673_s4, 32, %s678_s9, %s187_s14  }
  0x79 PF: > { %p320_p10 = scmp.ge.s32.totalorder %s510_s30, 2  ;;  %s215_s24 = sand.u32 1, %s490_s0  }
  0x7a   : > { %p737_p13 = scmp.ne.s32.totalorder %s732_s13, 0  ;;  %s216_s25 = scalar_lea.sflag [#allocation7], %s215_s24 }
  0x7c   : > { %p316_p12 = pnand %p320_p10, %p737_p13 }
  0x7e   : > { %485 = dma.done.wait (!%p316_p12), %s216_s25, 32  }
  0x7f   : > { %487 = vsyncadd (!%p316_p12), %s216_s25, 4294967264  ;;  %s27_s30 = sadd.s32 1, %s510_s30   ;;  %s738_s0 = smov %s494_s1 }
  0x80   : > { %p24_p1 = scmp.ge.s32.totalorder %s27_s30, 8   ;;  %s739_s1 = smov %s498_s27 }
  0x81   : > { %s740_s27 = smov %s607_s12  ;;  %s741_s28 = smov %s506_s29 }
  0x82   : > { %s742_s29 = smov %s744_s6  ;;  %26 = sbr.rel (!%p24_p1) target bundleno = 28 (0x1c), region = 69 }
  0x89   :  { %221 = vsyncpa [#allocation6], 1 }
  0x8a   :  { %223 = vsyncpa [#allocation6 + $0x1], 1 }
  0x8b   :  { %224 = vsyncpa [#allocation7], 1 }
  0x8c   :  { %226 = vsyncpa [#allocation7 + $0x1], 1 }

</bundles_post_ra>
